<compile_context>
chip_gen: v7x
topology: tpu7x:2x2x1
jax: 0.10.0
libtpu: 0.0.40
codegen_flags: <defaults>
</compile_context>

<pallas_src>
import functools

import jax
import jax.numpy as jnp
from jax.experimental import pallas as pl
from jax.experimental.pallas import tpu as pltpu

ENTROPIC_SCALE = 10.0
EPSILON = 1e-10
_CHUNK_LANES = 2048  # inner compute chunk: 16 f32 vregs per class row


def _isomax_loss_kernel(x_ref, t_ref, out_ref, acc_ref, *,
                        scale, hw, tile_p, chunk, n_chunks, rem):
    """Grid step (b, p, i): softmax over classes for one pixel tile, gather the
    target-class probability, -log(p+eps), masked reduce into a tiny acc."""
    p = pl.program_id(1)
    i = pl.program_id(2)
    # Global pixel offset of this tile.  Padded parallel tiles (clamped in the
    # index_map) land entirely past `hw` and are fully masked below.
    base = (p * pl.num_programs(2) + i) * tile_p

    @pl.when(i == 0)
    def _():
        acc_ref[...] = jnp.zeros_like(acc_ref)

    def process(x, t, start):
        # x: (C, width) logits chunk, t: (1, width) targets, start: lane offset.
        x = x.astype(jnp.float32)                     # bf16 inputs upcast here
        t = t.astype(jnp.int32)
        s = scale * x                                 # softmax(scale*logits) over classes
        m = jnp.max(s, axis=0, keepdims=True)         # small-C sublane reduce
        e = jnp.exp(s - m)
        denom = jnp.sum(e, axis=0, keepdims=True)
        cls = jax.lax.broadcasted_iota(jnp.int32, s.shape, 0)
        numer = jnp.sum(jnp.where(cls == t, e, 0.0), axis=0, keepdims=True)
        p_t = numer * pl.reciprocal(denom, approx=False)   # EUP slot
        losses = -jnp.log(p_t + EPSILON)              # keep PyTorch's +eps clamp
        # Mask ragged/padded pixels with a select (NaN-safe), before the reduce.
        pix = jax.lax.broadcasted_iota(jnp.int32, losses.shape, 1)
        losses = jnp.where(base + start + pix < hw, losses, 0.0)
        acc_ref[...] += jnp.sum(losses)               # cross-lane reduce: XLU slack

    if n_chunks == 1 and rem == 0:
        # chunk == tile_p: single full-block pass, no dynamic slicing.
        process(x_ref[...], t_ref[...], 0)
    else:
        # Loop over lane sub-chunks of the large VMEM block so intermediates
        # stay vreg-resident (DMA tile stays large).
        if n_chunks > 0:
            @pl.loop(0, n_chunks)
            def _(j):
                start = pl.multiple_of(j * chunk, chunk)
                process(x_ref[:, pl.ds(start, chunk)],
                        t_ref[:, pl.ds(start, chunk)], start)
        if rem > 0:
            start = n_chunks * chunk
            process(x_ref[:, pl.ds(start, rem)],
                    t_ref[:, pl.ds(start, rem)], start)

    @pl.when(i == pl.num_programs(2) - 1)
    def _():
        out_ref[...] = acc_ref[...]   # every lane holds the full partial sum


def _round_up(x, m):
    return (x + m - 1) // m * m


def isomax_plus_loss_second_part(logits, targets, entropic_scale=ENTROPIC_SCALE,
                                 max_block_bytes=8 * 1024 * 1024):
    """logits: (B, C, H, W) float; targets: (B, H, W) int.  Returns scalar loss."""
    B, C, H, W = logits.shape
    HW = H * W
    N = B * HW

    # ---- HBM traffic: native NCHW (free reshape) + narrow targets.
    x = logits.reshape(B, C, HW)
    if C <= 127:
        tgt_dtype = jnp.int8            # 4x less target HBM traffic
    elif C <= 32767:
        tgt_dtype = jnp.int16
    else:
        tgt_dtype = jnp.int32
    # TODO(synk): out-of-range labels (e.g. ignore_index=255) are not special-cased;
    # they yield p_t=0 -> loss ~= -log(1e-10) instead of PyTorch's gather error.
    t = targets.reshape(B, 1, HW).astype(tgt_dtype)

    # ---- Real (padded, double-buffered) VMEM footprint per lane of pixel tile.
    itemsize = jnp.dtype(logits.dtype).itemsize
    pack = {4: 8, 2: 16, 1: 32}
    bytes_x_lane = _round_up(C, pack[itemsize]) * itemsize
    t_itemsize = jnp.dtype(tgt_dtype).itemsize
    bytes_t_lane = pack[t_itemsize] * t_itemsize        # (1,P) block pads to pack sublanes
    per_lane = 2 * (bytes_x_lane + bytes_t_lane)         # x + targets, double-buffered

    # ---- Generation-aware VMEM budget (v5e/v6e: 128 MiB phys, v7x: 64 MiB/TC).
    try:
        vmem_phys = int(pltpu.get_tpu_info().vmem_capacity_bytes)
    except Exception:
        vmem_phys = 64 * 1024 * 1024                      # safe floor (v7x per-core)
    vmem_limit = min(vmem_phys // 2, 64 * 1024 * 1024)    # requested scoped limit
    usable = int(vmem_limit * 0.7)                        # headroom for acc/out/temps

    lanes_vmem = max(128, usable // per_lane)
    lanes_bw = max(128, max_block_bytes // (itemsize * C))  # nominal logits bytes cap
    tile_cap = max(128, (min(lanes_vmem, lanes_bw) // 128) * 128)

    if HW <= tile_cap:
        TILE_P = HW                                       # full extent: always legal
        chunk = min(_CHUNK_LANES, TILE_P)
        n_chunks = TILE_P // chunk
        rem = TILE_P - n_chunks * chunk
    else:
        if tile_cap >= _CHUNK_LANES:
            TILE_P = (tile_cap // _CHUNK_LANES) * _CHUNK_LANES
            chunk = _CHUNK_LANES
        else:
            TILE_P = tile_cap                             # multiple of 128
            chunk = TILE_P
        n_chunks = TILE_P // chunk
        rem = 0

    np_total = (HW + TILE_P - 1) // TILE_P
    # v7x has 2 TensorCores: guarantee a parallel extent >= 2 when B alone can't
    # provide it (extra axis is harmless on single-core v5e/v6e).
    P_PAR = 2 if (B % 2 == 1 and np_total >= 2) else 1
    np_inner = (np_total + P_PAR - 1) // P_PAR

    if P_PAR * np_inner == np_total:
        def in_map(b, p, i):
            return (b, 0, p * np_inner + i)
    else:
        def in_map(b, p, i):   # clamp padded tiles; kernel masks them to zero
            return (b, 0, jnp.minimum(p * np_inner + i, np_total - 1))

    def out_map(b, p, i):
        return (b * P_PAR + p, 0, 0)

    kernel = functools.partial(
        _isomax_loss_kernel,
        scale=float(entropic_scale),   # plain Python scalars: no captured consts
        hw=int(HW),
        tile_p=int(TILE_P),
        chunk=int(chunk),
        n_chunks=int(n_chunks),
        rem=int(rem),
    )

    partials = pl.pallas_call(
        kernel,
        out_shape=jax.ShapeDtypeStruct((B * P_PAR, 1, 128), jnp.float32),
        grid_spec=pltpu.PrefetchScalarGridSpec(
            num_scalar_prefetch=0,
            grid=(B, P_PAR, np_inner),
            in_specs=[
                pl.BlockSpec((None, C, TILE_P), in_map),
                pl.BlockSpec((None, 1, TILE_P), in_map),
            ],
            out_specs=pl.BlockSpec((None, 1, 128), out_map),
            scratch_shapes=[pltpu.VMEM((1, 128), jnp.float32)],
        ),
        compiler_params=pltpu.CompilerParams(
            dimension_semantics=("parallel", "parallel", "arbitrary"),
            vmem_limit_bytes=int(vmem_limit),
        ),
    )(x, t)

    total = jnp.sum(partials[:, 0, 0])       # tiny sum in XLA
    return total / jnp.float32(N)


def _reference_loss(logits, targets, entropic_scale=ENTROPIC_SCALE):
    """Pure-JAX reference mirroring the PyTorch forward exactly."""
    probs = jax.nn.softmax(entropic_scale * logits, axis=1)
    B, C, H, W = logits.shape
    probs = probs.reshape(B, C, H * W)
    tgt = targets.reshape(B, H * W)
    p_t = jnp.take_along_axis(probs, tgt[:, None, :], axis=1)[:, 0, :]
    return -jnp.mean(jnp.log(p_t + EPSILON))


if __name__ == "__main__":
    key = jax.random.PRNGKey(0)
    k1, k2, k3, k4, k5, k6, k7, k8 = jax.random.split(key, 8)

    # Test 1: spec-sized shapes (B=2, C=4, 16x16); single full-extent tile.
    B, C, H, W = 2, 4, 16, 16
    logits = jax.random.normal(k1, (B, C, H, W), dtype=jnp.float32)
    targets = jax.random.randint(k2, (B, H, W), 0, C, dtype=jnp.int32)
    loss = jax.block_until_ready(isomax_plus_loss_second_part(logits, targets))
    ref = jax.block_until_ready(_reference_loss(logits, targets))
    assert jnp.allclose(loss, ref, rtol=1e-5, atol=1e-5), (loss, ref)

    # Test 2: forced small tiles -> multi-tile accumulation, ragged last tile,
    # odd-batch parallel pixel split (P_PAR=2) with a clamped padded tile.
    B2, C2, H2, W2 = 1, 8, 10, 30
    logits2 = jax.random.normal(k3, (B2, C2, H2, W2), dtype=jnp.float32)
    targets2 = jax.random.randint(k4, (B2, H2, W2), 0, C2, dtype=jnp.int32)
    loss2 = jax.block_until_ready(
        isomax_plus_loss_second_part(logits2, targets2, max_block_bytes=4096))
    ref2 = jax.block_until_ready(_reference_loss(logits2, targets2))
    assert jnp.allclose(loss2, ref2, rtol=1e-5, atol=1e-5), (loss2, ref2)

    # Test 3: bf16 logits kept in bf16 on the HBM path, odd C, non-128 HW.
    B3, C3, H3, W3 = 3, 6, 8, 20
    logits3 = jax.random.normal(k5, (B3, C3, H3, W3), dtype=jnp.float32).astype(jnp.bfloat16)
    targets3 = jax.random.randint(k6, (B3, H3, W3), 0, C3, dtype=jnp.int32)
    loss3 = jax.block_until_ready(isomax_plus_loss_second_part(logits3, targets3))
    ref3 = jax.block_until_ready(
        _reference_loss(logits3.astype(jnp.float32), targets3))
    assert jnp.allclose(loss3, ref3, rtol=1e-5, atol=1e-5), (loss3, ref3)

    # Test 4: exercises the in-kernel chunk loop (2 full chunks) + remainder chunk.
    B4, C4, H4, W4 = 1, 4, 64, 72   # HW = 4608 = 2*2048 + 512
    logits4 = jax.random.normal(k7, (B4, C4, H4, W4), dtype=jnp.float32)
    targets4 = jax.random.randint(k8, (B4, H4, W4), 0, C4, dtype=jnp.int32)
    loss4 = jax.block_until_ready(isomax_plus_loss_second_part(logits4, targets4))
    ref4 = jax.block_until_ready(_reference_loss(logits4, targets4))
    assert jnp.allclose(loss4, ref4, rtol=1e-5, atol=1e-5), (loss4, ref4)

    print("KERNEL_OK")
</pallas_src>

<mosaic_0001>
module attributes {stable_mosaic.version = 11 : i64} {
  func.func @_isomax_loss_kernel(%arg0: i32, %arg1: i32, %arg2: i32, %arg3: memref<1x4x256xf32, #tpu.memory_space<vmem>>, %arg4: memref<1x1x256xi8, #tpu.memory_space<vmem>>, %arg5: memref<1x1x128xf32, #tpu.memory_space<vmem>>, %arg6: memref<1x128xf32, #tpu.memory_space<vmem>>) attributes {dimension_semantics = [#tpu.dimension_semantics<parallel>, #tpu.dimension_semantics<parallel>, #tpu.dimension_semantics<arbitrary>], iteration_bounds = array<i64: 2, 1, 1>, scalar_prefetch = 0 : i64, scratch_operands = 1 : i64, tpu.core_type = #tpu.core_type<tc>, window_params = [{transform_indices = @transform_0, window_bounds = array<i64: 1, 4, 256>}, {transform_indices = @transform_1, window_bounds = array<i64: 1, 1, 256>}, {transform_indices = @transform_2, window_bounds = array<i64: 1, 1, 128>}]} {
    %c1_i32 = arith.constant 1 : i32
    %0 = arith.muli %arg1, %c1_i32 : i32
    %1 = arith.addi %0, %arg2 : i32
    %c256_i32 = arith.constant 256 : i32
    %2 = arith.muli %1, %c256_i32 : i32
    %c0_i32 = arith.constant 0 : i32
    %3 = arith.cmpi eq, %arg2, %c0_i32 : i32
    %4 = arith.extui %3 : i1 to i32
    %c0_i32_0 = arith.constant 0 : i32
    %5 = arith.cmpi ne, %4, %c0_i32_0 : i32
    scf.if %5 {
      %cst_22 = arith.constant 0.000000e+00 : f32
      %53 = vector.broadcast %cst_22 : f32 to vector<1x128xf32>
      %c0_23 = arith.constant 0 : index
      %c0_24 = arith.constant 0 : index
      %54 = vector.load %arg6[%c0_23, %c0_24] : memref<1x128xf32, #tpu.memory_space<vmem>>, vector<1x128xf32>
      tpu.vector_store %arg6[%c0_23, %c0_24], %53 {strides = array<i32>} : memref<1x128xf32, #tpu.memory_space<vmem>>, vector<1x128xf32>,
    } else {
    }
    %c0 = arith.constant 0 : index
    %c0_1 = arith.constant 0 : index
    %c0_2 = arith.constant 0 : index
    %6 = vector.load %arg3[%c0, %c0_1, %c0_2] : memref<1x4x256xf32, #tpu.memory_space<vmem>>, vector<1x4x256xf32>
    %7 = vector.shape_cast %6 : vector<1x4x256xf32> to vector<4x256xf32>
    %c0_3 = arith.constant 0 : index
    %c0_4 = arith.constant 0 : index
    %c0_5 = arith.constant 0 : index
    %8 = vector.load %arg4[%c0_3, %c0_4, %c0_5] : memref<1x1x256xi8, #tpu.memory_space<vmem>>, vector<1x1x256xi8>
    %9 = vector.shape_cast %8 : vector<1x1x256xi8> to vector<1x256xi8>
    %10 = arith.extsi %9 : vector<1x256xi8> to vector<1x256xi32>
    %cst = arith.constant 1.000000e+01 : f32
    %11 = vector.broadcast %cst : f32 to vector<4x256xf32>
    %12 = arith.mulf %11, %7 : vector<4x256xf32>
    %cst_6 = arith.constant dense<0xFF800000> : vector<256xf32>
    %13 = vector.multi_reduction <maximumf>, %12, %cst_6 [0] : vector<4x256xf32> to vector<256xf32>
    %14 = vector.shape_cast %13 : vector<256xf32> to vector<1x256xf32>
    %15 = vector.broadcast %14 : vector<1x256xf32> to vector<4x256xf32>
    %16 = arith.subf %12, %15 : vector<4x256xf32>
    %17 = math.exp %16 : vector<4x256xf32>
    %cst_7 = arith.constant dense<0.000000e+00> : vector<256xf32>
    %18 = vector.multi_reduction <add>, %17, %cst_7 [0] : vector<4x256xf32> to vector<256xf32>
    %19 = vector.shape_cast %18 : vector<256xf32> to vector<1x256xf32>
    %20 = tpu.iota {dimensions = array<i32: 0>} : vector<4x256xi32>
    %21 = vector.broadcast %10 : vector<1x256xi32> to vector<4x256xi32>
    %22 = arith.cmpi eq, %20, %21 : vector<4x256xi32>
    %cst_8 = arith.constant 0.000000e+00 : f32
    %23 = vector.broadcast %cst_8 : f32 to vector<4x256xf32>
    %24 = arith.select %22, %17, %23 : vector<4x256xi1>, vector<4x256xf32>
    %cst_9 = arith.constant dense<0.000000e+00> : vector<256xf32>
    %25 = vector.multi_reduction <add>, %24, %cst_9 [0] : vector<4x256xf32> to vector<256xf32>
    %26 = vector.shape_cast %25 : vector<256xf32> to vector<1x256xf32>
    %27 = tpu.reciprocal %19 : vector<1x256xf32> -> vector<1x256xf32>
    %28 = arith.mulf %26, %27 : vector<1x256xf32>
    %cst_10 = arith.constant 1.000000e-10 : f32
    %29 = vector.broadcast %cst_10 : f32 to vector<1x256xf32>
    %30 = arith.addf %28, %29 : vector<1x256xf32>
    %31 = math.log %30 : vector<1x256xf32>
    %cst_11 = arith.constant 0.000000e+00 : f32
    %32 = vector.broadcast %cst_11 : f32 to vector<1x256xf32>
    %33 = arith.subf %32, %31 : vector<1x256xf32>
    %34 = tpu.iota {dimensions = array<i32: 1>} : vector<1x256xi32>
    %c0_i32_12 = arith.constant 0 : i32
    %35 = arith.addi %2, %c0_i32_12 : i32
    %36 = vector.broadcast %35 : i32 to vector<1x256xi32>
    %37 = arith.addi %36, %34 : vector<1x256xi32>
    %c256_i32_13 = arith.constant 256 : i32
    %38 = vector.broadcast %c256_i32_13 : i32 to vector<1x256xi32>
    %39 = arith.cmpi slt, %37, %38 : vector<1x256xi32>
    %cst_14 = arith.constant 0.000000e+00 : f32
    %40 = vector.broadcast %cst_14 : f32 to vector<1x256xf32>
    %41 = arith.select %39, %33, %40 : vector<1x256xi1>, vector<1x256xf32>
    %c0_15 = arith.constant 0 : index
    %c0_16 = arith.constant 0 : index
    %42 = vector.load %arg6[%c0_15, %c0_16] : memref<1x128xf32, #tpu.memory_space<vmem>>, vector<1x128xf32>
    %43 = vector.shape_cast %41 : vector<1x256xf32> to vector<1x1x256xf32>
    %cst_17 = arith.constant dense<0.000000e+00> : vector<1xf32>
    %44 = vector.multi_reduction <add>, %43, %cst_17 [1, 2] : vector<1x1x256xf32> to vector<1xf32>
    %45 = vector.shape_cast %44 : vector<1xf32> to vector<1x1x1xf32>
    %46 = vector.extract %45[0, 0, 0] : f32 from vector<1x1x1xf32>
    %47 = vector.broadcast %46 : f32 to vector<1x128xf32>
    %48 = arith.addf %42, %47 : vector<1x128xf32>
    %c0_18 = arith.constant 0 : index
    %c0_19 = arith.constant 0 : index
    %49 = vector.load %arg6[%c0_18, %c0_19] : memref<1x128xf32, #tpu.memory_space<vmem>>, vector<1x128xf32>
    tpu.vector_store %arg6[%c0_18, %c0_19], %48 {strides = array<i32>} : memref<1x128xf32, #tpu.memory_space<vmem>>, vector<1x128xf32>,
    %c0_i32_20 = arith.constant 0 : i32
    %50 = arith.cmpi eq, %arg2, %c0_i32_20 : i32
    %51 = arith.extui %50 : i1 to i32
    %c0_i32_21 = arith.constant 0 : i32
    %52 = arith.cmpi ne, %51, %c0_i32_21 : i32
    scf.if %52 {
      %c0_22 = arith.constant 0 : index
      %c0_23 = arith.constant 0 : index
      %53 = vector.load %arg6[%c0_22, %c0_23] : memref<1x128xf32, #tpu.memory_space<vmem>>, vector<1x128xf32>
      %c0_24 = arith.constant 0 : index
      %c0_25 = arith.constant 0 : index
      %c0_26 = arith.constant 0 : index
      %54 = vector.load %arg5[%c0_24, %c0_25, %c0_26] : memref<1x1x128xf32, #tpu.memory_space<vmem>>, vector<1x1x128xf32>
      %55 = vector.shape_cast %54 : vector<1x1x128xf32> to vector<1x128xf32>
      %56 = vector.shape_cast %53 : vector<1x128xf32> to vector<1x1x128xf32>
      tpu.vector_store %arg5[%c0_24, %c0_25, %c0_26], %56 {strides = array<i32>} : memref<1x1x128xf32, #tpu.memory_space<vmem>>, vector<1x1x128xf32>,
    } else {
    }
    return
  }
  func.func @transform_0(%arg0: i32, %arg1: i32, %arg2: i32) -> (i32, i32, i32) {
    %c1_i32 = arith.constant 1 : i32
    %0 = arith.muli %arg1, %c1_i32 : i32
    %1 = arith.addi %0, %arg2 : i32
    %c0_i32 = arith.constant 0 : i32
    %c0_i32_0 = arith.constant 0 : i32
    return %arg0, %c0_i32, %1 : i32, i32, i32
  }
  func.func @transform_1(%arg0: i32, %arg1: i32, %arg2: i32) -> (i32, i32, i32) {
    %c1_i32 = arith.constant 1 : i32
    %0 = arith.muli %arg1, %c1_i32 : i32
    %1 = arith.addi %0, %arg2 : i32
    %c0_i32 = arith.constant 0 : i32
    %c0_i32_0 = arith.constant 0 : i32
    return %arg0, %c0_i32, %1 : i32, i32, i32
  }
  func.func @transform_2(%arg0: i32, %arg1: i32, %arg2: i32) -> (i32, i32, i32) {
    %c1_i32 = arith.constant 1 : i32
    %0 = arith.muli %arg0, %c1_i32 : i32
    %1 = arith.addi %0, %arg1 : i32
    %c0_i32 = arith.constant 0 : i32
    %c0_i32_0 = arith.constant 0 : i32
    %c0_i32_1 = arith.constant 0 : i32
    return %1, %c0_i32, %c0_i32_0 : i32, i32, i32
  }
}

</mosaic_0001>

<bundles_post_ra>
// kernel: tpu_custom_call.1
= control target key start
LH: loop header
LB: loop body
LE: loop exit
PB: predicated region body
PF: predicated region fallthrough
CT: control target
= control target key end

     0   :  { %7 = vsyncpa [#allocation4], 0  ;;  %s879_s0 = inlined_call_operand.hbm [shape: f32[2,4,256], index: 0, kind: input, shape index: {}]   ;;  %s880_s1 = inlined_call_operand.vmem [shape: s8[2,1,256], index: 1, kind: input, shape index: {}]   ;;  %s881_s2 = inlined_call_operand.hbm [shape: f32[2,1,128], index: 2, kind: output, shape index: {}]  }
   0x1   :  { %9 = vsyncpa [#allocation4 + $0x1], 0 }
   0x2   :  { %10 = vsyncpa [#allocation5], 0 }
   0x3   :  { %12 = vsyncpa [#allocation5 + $0x1], 0  ;;  %s695_s9 = smov 0   ;;  %s697_s10 = smov 0  }
   0x4   :  { %s699_s11 = smov 0   ;;  %s701_s12 = smov 0  }
   0x5   :  { %s703_s13 = smov 0   ;;  %s705_s14 = smov 0  }
   0x6 LB: > { %s474_s15 = sadd.s32 4294967295, %s675_s14   ;;  %s475_s16 = sadd.s32 4294967294, %s675_s14   ;;  %s675_s14 = sphi %s705_s14, %s18_s14   ;;  %s671_s13 = sphi %s703_s13, %s897_s13   ;;  %s667_s12 = sphi %s701_s12, %s896_s12   ;;  %s663_s11 = sphi %s699_s11, %s895_s11   ;;  %s659_s10 = sphi %s697_s10, %s894_s10   ;;  %s655_s9 = sphi %s695_s9, %s893_s9  }
   0x7   : > { %s37_s17 = sadd.s32 1, %s671_s13  ;;  %s48_s18 = sadd.s32 1, %s663_s11 }
   0x8   : > { %p39_p0 = scmp.ge.s32.totalorder %s37_s17, 2  ;;  %p55_p1 = scmp.ne.s32.totalorder %s663_s11, %s659_s10 }
   0x9   : > { %p56_p2 = scmp.eq.s32.totalorder %s675_s14, 0  ;;  %p61_p3 = scmp.ne.s32.totalorder %s659_s10, %s655_s9 }
   0xa   : > { %s899_s17 = smov (%p39_p0, %s37_s17), 0  ;;  %p62_p5 = scmp.eq.s32.totalorder %s474_s15, 0 }
   0xb   : > { %p736_p4 = por %p56_p2, %p55_p1  ;;  %s43_s20 = ssub.s32 %s671_s13, %s899_s17 }
   0xc   : > { %p117_p6 = scmp.eq.s32.totalorder %s474_s15, 1  ;;  %p46_p7 = scmp.eq.s32.totalorder %s43_s20, 0 }
   0xd   : > { %p742_p8 = por %p62_p5, %p61_p3  ;;  %p123_p10 = scmp.eq.s32.totalorder %s475_s16, 1 }
   0xe   : > { %p746_p9 = por %p117_p6, %p55_p1  ;;  %p502_p13 = scmp.lt.s32.totalorder %s675_s14, 2 }
   0xf   : > { %s751_s23 = scalar_select %p46_p7, %s663_s11, %s48_s18  }
  0x10   : > { %s885_s22 = scalar_select %p746_p9, 1, 0 }
  0x11   : > { %p753_p11 = por %p123_p10, %p61_p3  ;;  %s143_s25 = sand.u32 1, %s663_s11  }
  0x12   : > { %s478_s26 = sshll.u32 %s143_s25, 3  ;;  %s487_s27 = sshll.u32 %s671_s13, 7 }
  0x13   : > { %s886_s24 = scalar_select %p753_p11, 1, 0 }
  0x14   : > { %s764_s30 = scalar_lea.hbm %s879_s0, %s487_s27  ;;  %s147_s3 = scalar_lea.vmem [#allocation3], %s478_s26 }
  0x15   : > { %s158_s4 = sshll.u32 %s147_s3, 4  ;;  %p770_p0 = pnand %p502_p13, %p736_p4  ;;  %s766_s4 = int_to_ptr.vmem [resolvable:$true] %s158_s4 }
  0x16   : > { %s144_s6 = scalar_lea.sflag [#allocation4], %s143_s25  ;;  %s563_s7 = scalar_lea.hbm %s764_s30, 128 }
  0x17   : > { %p564_p3 = scmp.ne.s32.totalorder %s764_s30, %s563_s7  ;;  %p565_p5 = pneg %p770_p0 }
  0x18   : > { %s568_s16 = scalar_lea.hbm %s879_s0, 256  ;;  %p569_p4 = scmp.lt.u32.totalorder %s764_s30, %s879_s0 }
  0x19   : > { %p566_p6 = pnand %p565_p5, %p564_p3  ;;  %p570_p10 = scmp.lt.u32.totalorder %s568_s16, %s563_s7 }
  0x1a   : > { %p572_p12 = scmp.lt.u32.totalorder %s563_s7, %s764_s30 }
  0x1b   : > { %p567_p7 = pneg %p566_p6  ;;  %p571_p13 = por %p570_p10, %p569_p4 }
  0x1d   : > { %p573_p1 = por %p572_p12, %p571_p13 }
  0x1f   : > { %p574_p2 = pnand %p573_p1, %p567_p7 }
  0x21   : > { %577 = shalt.err (!%p574_p2)
}
  0x22   : > { %s578_s20 = scalar_lea.vmem %s766_s4, 128  ;;  %s677_s25 = smov [#allocation3]  }
  0x23   : > { %p579_p3 = scmp.ne.s32.totalorder %s766_s4, %s578_s20  ;;  %s583_s26 = sshll.u32 %s677_s25, 4  ;;  %s584_s26 = int_to_ptr.vmem [resolvable:$false] %s583_s26 }
  0x24   : > { %s585_s27 = scalar_lea.vmem %s584_s26, 256  ;;  %p586_p9 = scmp.lt.s32.totalorder %s766_s4, %s584_s26 }
  0x25   : > { %p581_p6 = pnand %p579_p3, %p565_p5  ;;  %p587_p4 = scmp.lt.s32.totalorder %s585_s27, %s578_s20 }
  0x27   : > { %p582_p11 = pneg %p581_p6  ;;  %p588_p10 = por %p587_p4, %p586_p9 }
  0x29   : > { %p589_p12 = pnand %p588_p10, %p582_p11 }
  0x2b   : > { %592 = shalt.err (!%p589_p12)
}
  0x2c   : > { %497 = dma.hbm_to_vmem [thread:$0]  (!%p770_p0), %s764_s30, 128, %s766_s4, %s144_s6  }
  0x2d   : > { %p888_p1 = scmp.lt.s32.totalorder %s675_s14, 3  ;;  %p889_p2 = scmp.ge.s32.totalorder %s675_s14, 1 }
  0x2f   : > { %p178_p5 = pnand %p889_p2, %p888_p1 }
  0x30   : > { %s806_s28 = sand.u32 (!%p178_p5), 1, %s659_s10  }
  0x31   : > { %181 = sbr.rel (%p178_p5) target bundleno = 369 (0x171), region = 28  ;;  %s482_s29 = sshll.u32 (!%p178_p5), %s806_s28, 3 }
  0x32   : > { %s184_s3 = scalar_lea.sflag (!%p178_p5), [#allocation4], %s806_s28  ;;  %s187_s7 = scalar_lea.vmem (!%p178_p5), [#allocation3], %s482_s29 }
  0x38   : > { %646 = dma.done.wait (%p742_p8), %s184_s3, 128  }
  0x39   : > { %648 = vsyncadd (%p742_p8), %s184_s3, 4294967168  ;;  %v237_v0 = vld [vmem:[%s187_s7] sm:$0xff]  ;;  %vm244_vm0 = vcmask 1043456   ;;  %p220_p9 = scmp.lt.s32.totalorder %s667_s12, 1  ;;  %v283_v14 = vlaneseq  ;;  %vm342_vm3 = vcmask 1040384   ;;  %s484_s15 = sshll.u32 %s667_s12, 4 }
  0x3a   : > { %v240_v1 = vmul.f32 10.0, %v237_v0  ;;  %s215_s16 = scalar_lea.vmem [#allocation6], %s806_s28  ;;  %s830_s25 = scalar_lea.hbm %s881_s2, %s484_s15 }
  0x3b   : > { %s221_s30 = scalar_select %p220_p9, %s667_s12, 1  ;;  %v284_v18 = vshrl.u32 %v283_v14, 7 }
  0x3c   : > { %v242_v2 = vcombine.high %v240_v1, %v240_v1  ;;  %v245_v3 = vsel %vm244_vm0, %v240_v1, -inf  ;;  %s377_s18 = sshll.u32 %s215_s16, 4  ;;  %s364_s26 = scalar_lea.sflag [#allocation5], %s806_s28  ;;  %s832_s18 = int_to_ptr.vmem [resolvable:$true] %s377_s18 }
  0x3d   : > { %v246_v4 = vrot.slane %v245_v3, 4  ;;  %s483_s21 = sshll.u32 %s221_s30, 1  ;;  %v287_v23 = vsub.s32 0, %v284_v18  ;;  %v291_v25 = vsub.s32 4, %v284_v18  ;;  %s593_s27 = scalar_lea.vmem %s832_s18, 16 }
  0x3e   : > { %v252_v5 = vsel %vm244_vm0, %v242_v2, -inf  ;;  %s226_s6 = scalar_lea.vmem %s880_s1, %s483_s21  ;;  %p594_p8 = scmp.ne.s32.totalorder %s832_s18, %s593_s27 }
  0x3f   : > { %v247_v6 = vmax.f32 %v245_v3, %v246_v4  ;;  %v253_v7 = vrot.slane %v252_v5, 4  ;;  %v238_v19 = vld [vmem:[%s226_s6] sm:$0x3]  ;;  %p890_p11 = scmp.ne.s32.totalorder %s885_s22, 0  ;;  %s679_s12 = smov [#allocation6]  }
  0x40   : > { %v239_v21 = vunpack.c.0.s8 %v238_v19  ;;  %s597_s29 = sshll.u32 %s679_s12, 4  ;;  %s598_s29 = int_to_ptr.vmem [resolvable:$false] %s597_s29 }
  0x41   : > { %v248_v8 = vrot.slane %v247_v6, 2  ;;  %v254_v9 = vmax.f32 %v252_v5, %v253_v7  ;;  %p595_p0 = pnand %p594_p8, %p890_p11  ;;  %s599_s3 = scalar_lea.vmem %s598_s29, 32 }
  0x42   : > { %v288_v26 = vrot.slane %v239_v21, %v287_v23  ;;  %v292_v27 = vrot.slane %v239_v21, %v291_v25  ;;  %p600_p13 = scmp.lt.s32.totalorder %s832_s18, %s598_s29  ;;  %p601_p3 = scmp.lt.s32.totalorder %s599_s3, %s593_s27 }
  0x43   : > { %v249_v10 = vmax.f32 %v247_v6, %v248_v8  ;;  %v255_v11 = vrot.slane %v254_v9, 2  ;;  %p596_p7 = pneg %p595_p0 }
  0x44   : > { %v296_v28 = vrot.slane %v288_v26, %v287_v23  ;;  %v300_v29 = vrot.slane %v292_v27, %v287_v23  ;;  %p602_p6 = por %p601_p3, %p600_p13 }
  0x45   : > { %v250_v12 = vrot.slane %v249_v10, 1  ;;  %v256_v13 = vmax.f32 %v254_v9, %v255_v11 }
  0x46   : > { %vm301_vm1 = vcmp.eq.s32.totalorder %v284_v18, %v296_v28  ;;  %vm302_vm2 = vcmp.eq.s32.totalorder %v284_v18, %v300_v29  ;;  %p603_p4 = pnand %p602_p6, %p596_p7 }
  0x47   : > { %v251_v15 = vmax.f32 %v249_v10, %v250_v12  ;;  %v257_v16 = vrot.slane %v256_v13, 1 }
  0x49   : > { %v258_v17 = vmax.f32 %v256_v13, %v257_v16  ;;  %v678_v13 = vmov 0.0  }
  0x4a   : > { %236 = vst [vmem:[#allocation2] sm:$0x1] %v678_v13 }
  0x4b   : > { %v261_v20 = vcombine.low %v251_v15, %v258_v17 }
  0x4d   : > { %v263_v22 = vsub.f32 %v240_v1, %v261_v20 }
  0x4f   : > { %v264_v24 = vmul.f32 1.442695, %v263_v22 }
  0x51   : > { %553 = vpow2.f32 %v264_v24  ;;  %v341_v21 = vld [vmem:[#allocation2] sm:$0x1] }
  0x5b   : > { %v554_v30 = vpop.eup %553 }
  0x5c   : > { %v267_v31 = vcombine.high %v554_v30, %v554_v30  ;;  %v269_v32 = vsel %vm244_vm0, %v554_v30, 0.0  ;;  %v303_v33 = vsel %vm301_vm1, %v554_v30, 0.0 }
  0x5d   : > { %v270_v34 = vrot.slane %v269_v32, 4  ;;  %v305_v35 = vsel %vm244_vm0, %v303_v33, 0.0 }
  0x5e   : > { %v276_v36 = vsel %vm244_vm0, %v267_v31, 0.0  ;;  %v304_v37 = vsel %vm302_vm2, %v267_v31, 0.0  ;;  %v306_v38 = vrot.slane %v305_v35, 4 }
  0x5f   : > { %v271_v39 = vadd.f32 %v270_v34, %v269_v32  ;;  %v277_v40 = vrot.slane %v276_v36, 4  ;;  %v312_v41 = vsel %vm244_vm0, %v304_v37, 0.0 }
  0x60   : > { %v307_v42 = vadd.f32 %v306_v38, %v305_v35  ;;  %v313_v43 = vrot.slane %v312_v41, 4 }
  0x61   : > { %v272_v44 = vrot.slane %v271_v39, 2  ;;  %v278_v45 = vadd.f32 %v277_v40, %v276_v36 }
  0x62   : > { %v314_v46 = vadd.f32 %v313_v43, %v312_v41  ;;  %v308_v49 = vrot.slane %v307_v42, 2 }
  0x63   : > { %v273_v47 = vadd.f32 %v272_v44, %v271_v39  ;;  %v279_v48 = vrot.slane %v278_v45, 2 }
  0x64   : > { %v315_v52 = vrot.slane %v314_v46, 2  ;;  %v309_v55 = vadd.f32 %v308_v49, %v307_v42 }
  0x65   : > { %v274_v50 = vrot.slane %v273_v47, 1  ;;  %v280_v51 = vadd.f32 %v279_v48, %v278_v45 }
  0x66   : > { %v316_v57 = vadd.f32 %v315_v52, %v314_v46  ;;  %v310_v58 = vrot.slane %v309_v55, 1 }
  0x67   : > { %v275_v53 = vadd.f32 %v274_v50, %v273_v47  ;;  %v281_v54 = vrot.slane %v280_v51, 1 }
  0x68   : > { %v317_v59 = vrot.slane %v316_v57, 1  ;;  %v311_v60 = vadd.f32 %v310_v58, %v309_v55 }
  0x69   : > { %v282_v56 = vadd.f32 %v281_v54, %v280_v51  ;;  %555 = vrcp.f32 %v275_v53 }
  0x6a   : > { %v318_v61 = vadd.f32 %v317_v59, %v316_v57 }
  0x6b   : > { %557 = vrcp.f32 %v282_v56 }
  0x73   : > { %v556_v62 = vpop.eup %555 }
  0x74   : > { %v321_v63 = vmul.f32 %v556_v62, %v311_v60 }
  0x75   : > { %v558_v0 = vpop.eup %557 }
  0x76   : > { %v322_v1 = vmul.f32 %v558_v0, %v318_v61  ;;  %v323_v2 = vadd.f32 1e-10, %v321_v63 }
  0x78   : > { %v324_v3 = vadd.f32 1e-10, %v322_v1  ;;  %559 = vlog2.f32 %v323_v2 }
  0x7a   : > { %561 = vlog2.f32 %v324_v3 }
  0x82   : > { %v560_v4 = vpop.eup %559 }
  0x83   : > { %v326_v5 = vmul.f32 0.6931472, %v560_v4 }
  0x84   : > { %v562_v6 = vpop.eup %561 }
  0x85   : > { %v328_v7 = vmul.f32 0.6931472, %v562_v6  ;;  %v329_v8 = vsub.f32 0.0, %v326_v5 }
  0x87   : > { %v330_v9 = vsub.f32 0.0, %v328_v7  ;;  %v343_v10 = vsel %vm342_vm3, %v329_v8, 0.0 }
  0x89   : > { %v344_v11 = vsel %vm342_vm3, %v330_v9, 0.0 }
  0x8a   : > { %v345_v12 = vadd.f32 %v344_v11, %v343_v10 }
  0x8c   : > { %346 = vadd.xlane.f32.xlu0 %v345_v12 }
 0x119   : > { %v347_v14 = vpop.xlane.xlu0 %346 }
 0x11a   : > { %v348_v15 = vrot.slane %v347_v14, 4 }
 0x11c   : > { %v349_v16 = vadd.f32 %v348_v15, %v347_v14 }
 0x11e   : > { %v350_v17 = vrot.slane %v349_v16, 2 }
 0x120   : > { %v351_v18 = vadd.f32 %v350_v17, %v349_v16 }
 0x122   : > { %v352_v19 = vrot.slane %v351_v18, 1 }
 0x124   : > { %v353_v20 = vadd.f32 %v352_v19, %v351_v18 }
 0x126   : > { %488 = vpush %v353_v20 }
 0x157   : > { %s489_s8 = spop %488 }
 0x158   : > { %v355_v22 = vstv %s489_s8 }
 0x159   : > { %v356_v23 = vadd.f32 %v355_v22, %v341_v21 }
 0x15b   : > { %357 = vst [vmem:[#allocation2] sm:$0x1] %v356_v23 }
 0x162   : > { %v361_v24 = vld [vmem:[#allocation2] sm:$0x1] }
 0x163   : > { %362 = vst [vmem:[%s215_s16] sm:$0x1] %v361_v24 }
 0x164   : > { %606 = shalt.err (!%p603_p4)
}
 0x165   : > { %s607_s28 = scalar_lea.hbm %s830_s25, 16  ;;  %s611_s21 = scalar_lea.hbm %s881_s2, 32 }
 0x166   : > { %p608_p10 = scmp.ne.s32.totalorder %s830_s25, %s607_s28  ;;  %p612_p2 = scmp.lt.u32.totalorder %s830_s25, %s881_s2 }
 0x167   : > { %p613_p5 = scmp.lt.u32.totalorder %s611_s21, %s607_s28  ;;  %p615_p8 = scmp.lt.u32.totalorder %s607_s28, %s830_s25 }
 0x168   : > { %p609_p12 = pnand %p608_p10, %p890_p11 }
 0x169   : > { %p614_p9 = por %p613_p5, %p612_p2 }
 0x16a   : > { %p610_p1 = pneg %p609_p12 }
 0x16b   : > { %p616_p0 = por %p615_p8, %p614_p9 }
 0x16d   : > { %p617_p7 = pnand %p616_p0, %p610_p1 }
 0x16f   : > { %620 = shalt.err (!%p617_p7)
}
 0x170   : > { %492 = dma.vmem_to_hbm [thread:$0]  (%p890_p11), %s832_s18, 16, %s830_s25, %s364_s26  }
 0x171 PF: > { %s389_s6 = sand.u32 1, %s655_s9   ;;  %p891_p13 = scmp.ne.s32.totalorder %s886_s24, 0 }
 0x172   : > { %p892_p3 = scmp.ge.s32.totalorder %s675_s14, 2  ;;  %s390_s8 = scalar_lea.sflag [#allocation5], %s389_s6 }
 0x174   : > { %p499_p6 = pnand %p892_p3, %p891_p13 }
 0x176   : > { %650 = dma.done.wait (!%p499_p6), %s390_s8, 16  }
 0x177   : > { %652 = vsyncadd (!%p499_p6), %s390_s8, 4294967280  ;;  %s18_s14 = sadd.s32 1, %s675_s14   ;;  %s893_s9 = smov %s659_s10 }
 0x178   : > { %p15_p4 = scmp.ge.s32.totalorder %s18_s14, 4   ;;  %s894_s10 = smov %s663_s11 }
 0x179   : > { %s895_s11 = smov %s751_s23  ;;  %s896_s12 = smov %s671_s13 }
 0x17a   : > { %s897_s13 = smov %s899_s17  ;;  %17 = sbr.rel (!%p15_p4) target bundleno = 6 (0x6), region = 84 }
 0x181   :  { %394 = vsyncpa [#allocation4], 1 }
 0x182   :  { %396 = vsyncpa [#allocation4 + $0x1], 1 }
 0x183   :  { %397 = vsyncpa [#allocation5], 1 }
 0x184   :  { %399 = vsyncpa [#allocation5 + $0x1], 1 }

</bundles_post_ra>
